<compile_context>
chip_gen: v5e
topology: v5e:2x2
jax: 0.10.0
libtpu: 0.0.40
codegen_flags: <defaults>
</compile_context>

<pallas_src>
import functools

import jax
import jax.numpy as jnp
from jax.experimental import pallas as pl
from jax.experimental.pallas import tpu as pltpu

_LANE = 128


def _mlp_kernel(x_ref,
                w1_ref, b1_ref,
                w2_ref, b2_ref,
                w3_ref, b3_ref,
                w4_ref, b4_ref,
                o_ref,
                *, act_dtype):
    """Transposed MLP: x_ref (3, TB), w_k (out, in) bf16, b_k (out, 1) f32, o_ref (2, TB)."""
    bf16 = jnp.dtype(jnp.bfloat16)

    def act(h):
        # bf16 tanh on v6e/v7x (single EUP slot is the likely binding unit);
        # f32 tanh on v5e (no bf16 EUP/VPU).  Either way feed bf16 to the MXU.
        if jnp.dtype(act_dtype) == bf16:
            return jnp.tanh(h.astype(jnp.bfloat16))
        return jnp.tanh(h).astype(jnp.bfloat16)

    x = x_ref[...].astype(jnp.bfloat16)                                  # (3, TB)

    # Layer 1 (3 -> 64) on the MXU: push count is TB/8 regardless of K=3.
    h = jnp.dot(w1_ref[...], x, preferred_element_type=jnp.float32) + b1_ref[...]
    h = act(h)                                                           # (64, TB)

    h = jnp.dot(w2_ref[...], h, preferred_element_type=jnp.float32) + b2_ref[...]
    h = act(h)                                                           # (128, TB)

    h = jnp.dot(w3_ref[...], h, preferred_element_type=jnp.float32) + b3_ref[...]
    h = act(h)                                                           # (64, TB)

    out = jnp.dot(w4_ref[...], h, preferred_element_type=jnp.float32) + b4_ref[...]
    o_ref[...] = out.astype(o_ref.dtype)                                 # (2, TB) lane-dense


def _round_up(n, m):
    return ((n + m - 1) // m) * m


def simple_dnn_forward(x, params, *, block_rows=8192, act_dtype=jnp.bfloat16):
    """x: (B, 3) float32; params: list of (W, b) with W (in, out), b (1, out).

    block_rows: batch-tile size (rounded to a multiple of 128 lanes). 8192 keeps
    the per-tile VMEM footprint ~12-16 MiB (well under the 48 MiB limit set
    below) while amortizing per-grid-step overhead.
    act_dtype: jnp.bfloat16 (default, best on v6e/v7x) or jnp.float32 (v5e).
    """
    B = x.shape[0]
    (w1, b1), (w2, b2), (w3, b3), (w4, b4) = params

    block_rows = _round_up(max(block_rows, _LANE), _LANE)

    # Batch tiling: lane-dense tiles (multiple of 128).  If the whole batch fits
    # in one tile, still split into 2 grid steps so both v7x TCs get work.
    padded_B = _round_up(B, _LANE)
    if padded_B > block_rows:
        TB = block_rows
    else:
        TB = max(_LANE, _round_up(pl.cdiv(padded_B, 2), _LANE))
    padded_B = _round_up(padded_B, TB)

    if padded_B != B:
        x = jnp.pad(x, ((0, padded_B - B), (0, 0)))
    xt = x.T                                   # (3, padded_B): lane-dense input

    # Transposed weights (out, in) in bf16 for the MXU; biases as (out, 1) f32.
    w1t = w1.T.astype(jnp.bfloat16)            # (64, 3)
    w2t = w2.T.astype(jnp.bfloat16)            # (128, 64)
    w3t = w3.T.astype(jnp.bfloat16)            # (64, 128)
    w4t = w4.T.astype(jnp.bfloat16)            # (2, 64)
    b1t = b1.reshape(-1, 1)                    # (64, 1)
    b2t = b2.reshape(-1, 1)                    # (128, 1)
    b3t = b3.reshape(-1, 1)                    # (64, 1)
    b4t = b4.reshape(-1, 1)                    # (2, 1)

    def const(a):
        return pl.BlockSpec(a.shape, lambda i: (0,) * a.ndim)

    flops = 2 * padded_B * (3 * 64 + 64 * 128 + 128 * 64 + 64 * 2)
    transcendentals = padded_B * (64 + 128 + 64)
    weight_bytes = sum(int(w.size) * 2 + int(b.size) * 4
                       for w, b in ((w1t, b1t), (w2t, b2t), (w3t, b3t), (w4t, b4t)))
    bytes_accessed = padded_B * (3 + 2) * 4 + weight_bytes

    out_t = pl.pallas_call(
        functools.partial(_mlp_kernel, act_dtype=act_dtype),
        out_shape=jax.ShapeDtypeStruct((2, padded_B), jnp.float32),
        grid=(padded_B // TB,),
        in_specs=[
            pl.BlockSpec((3, TB), lambda i: (0, i)),   # x: tiled along the lane (batch) axis
            const(w1t), const(b1t),
            const(w2t), const(b2t),
            const(w3t), const(b3t),
            const(w4t), const(b4t),
        ],
        out_specs=pl.BlockSpec((2, TB), lambda i: (0, i)),  # lane-dense output block
        compiler_params=pltpu.CompilerParams(
            dimension_semantics=("parallel",),               # megacore sharding on v7x
            vmem_limit_bytes=48 * 1024 * 1024,                # headroom on v7x's 64 MiB
        ),
        cost_estimate=pl.CostEstimate(
            flops=flops,
            transcendentals=transcendentals,
            bytes_accessed=bytes_accessed,
        ),
    )(xt, w1t, b1t, w2t, b2t, w3t, b3t, w4t, b4t)

    out = out_t.T                              # (padded_B, 2)
    return out[:B] if padded_B != B else out


def init_params(key):
    """Deterministic init mimicking nn.Linear default: U(-1/sqrt(fan_in), 1/sqrt(fan_in))."""
    dims = [(3, 64), (64, 128), (128, 64), (64, 2)]
    params = []
    for i, (fan_in, fan_out) in enumerate(dims):
        kw, kb = jax.random.split(jax.random.fold_in(key, i))
        bound = 1.0 / jnp.sqrt(float(fan_in))
        W = jax.random.uniform(kw, (fan_in, fan_out), jnp.float32, -bound, bound)
        b = jax.random.uniform(kb, (1, fan_out), jnp.float32, -bound, bound)
        params.append((W, b))
    return params


def reference_forward(x, params):
    h = x
    for i, (W, b) in enumerate(params):
        h = h @ W + b
        if i < len(params) - 1:
            h = jnp.tanh(h)
    return h


if __name__ == "__main__":
    key = jax.random.PRNGKey(0)
    params = init_params(key)

    B = 10  # small, non-multiple-of-128 batch to exercise the tail-padding path
    x = jax.random.normal(jax.random.fold_in(key, 100), (B, 3), jnp.float32)

    out = simple_dnn_forward(x, params)
    out = jax.block_until_ready(out)

    ref = reference_forward(x, params)  # pure f32 reference
    assert out.shape == (B, 2), out.shape
    # Tolerance covers bf16 MXU operands + bf16 tanh (f32 accumulation throughout).
    max_err = float(jnp.max(jnp.abs(out - ref)))
    assert jnp.allclose(out, ref, atol=5e-2, rtol=5e-2), max_err

    print("KERNEL_OK")
</pallas_src>

<mosaic_0001>
module attributes {stable_mosaic.version = 11 : i64} {
  func.func @_mlp_kernel(%arg0: i32, %arg1: memref<3x128xf32, #tpu.memory_space<vmem>>, %arg2: memref<64x3xbf16, #tpu.memory_space<vmem>>, %arg3: memref<64x1xf32, #tpu.memory_space<vmem>>, %arg4: memref<128x64xbf16, #tpu.memory_space<vmem>>, %arg5: memref<128x1xf32, #tpu.memory_space<vmem>>, %arg6: memref<64x128xbf16, #tpu.memory_space<vmem>>, %arg7: memref<64x1xf32, #tpu.memory_space<vmem>>, %arg8: memref<2x64xbf16, #tpu.memory_space<vmem>>, %arg9: memref<2x1xf32, #tpu.memory_space<vmem>>, %arg10: memref<2x128xf32, #tpu.memory_space<vmem>>) attributes {dimension_semantics = [#tpu.dimension_semantics<parallel>], iteration_bounds = array<i64: 1>, scalar_prefetch = 0 : i64, scratch_operands = 0 : i64, tpu.core_type = #tpu.core_type<tc>, window_params = [{transform_indices = @transform_0, window_bounds = array<i64: 3, 128>}, {pipeline_mode = #tpu.pipeline_mode<synchronous>, transform_indices = @transform_1, window_bounds = array<i64: 64, 3>}, {pipeline_mode = #tpu.pipeline_mode<synchronous>, transform_indices = @transform_2, window_bounds = array<i64: 64, 1>}, {pipeline_mode = #tpu.pipeline_mode<synchronous>, transform_indices = @transform_3, window_bounds = array<i64: 128, 64>}, {pipeline_mode = #tpu.pipeline_mode<synchronous>, transform_indices = @transform_4, window_bounds = array<i64: 128, 1>}, {pipeline_mode = #tpu.pipeline_mode<synchronous>, transform_indices = @transform_5, window_bounds = array<i64: 64, 128>}, {pipeline_mode = #tpu.pipeline_mode<synchronous>, transform_indices = @transform_6, window_bounds = array<i64: 64, 1>}, {pipeline_mode = #tpu.pipeline_mode<synchronous>, transform_indices = @transform_7, window_bounds = array<i64: 2, 64>}, {pipeline_mode = #tpu.pipeline_mode<synchronous>, transform_indices = @transform_8, window_bounds = array<i64: 2, 1>}, {transform_indices = @transform_9, window_bounds = array<i64: 2, 128>}]} {
    %c0 = arith.constant 0 : index
    %c0_0 = arith.constant 0 : index
    %0 = vector.load %arg1[%c0, %c0_0] : memref<3x128xf32, #tpu.memory_space<vmem>>, vector<3x128xf32>
    %1 = arith.truncf %0 : vector<3x128xf32> to vector<3x128xbf16>
    %c0_1 = arith.constant 0 : index
    %c0_2 = arith.constant 0 : index
    %2 = vector.load %arg2[%c0_1, %c0_2] : memref<64x3xbf16, #tpu.memory_space<vmem>>, vector<64x3xbf16>
    %cst = arith.constant dense<0.000000e+00> : vector<64x128xf32>
    %3 = tpu.matmul %2, %1, %cst {dimension_numbers = #tpu.dot_dimension_numbers<[1], [0], [0], [1], [0, 0, 1, 1], [], []>} : vector<64x3xbf16>, vector<3x128xbf16>, vector<64x128xf32> -> vector<64x128xf32>
    %c0_3 = arith.constant 0 : index
    %c0_4 = arith.constant 0 : index
    %4 = vector.load %arg3[%c0_3, %c0_4] : memref<64x1xf32, #tpu.memory_space<vmem>>, vector<64x1xf32>
    %5 = vector.broadcast %4 : vector<64x1xf32> to vector<64x128xf32>
    %6 = arith.addf %3, %5 : vector<64x128xf32>
    %7 = arith.truncf %6 : vector<64x128xf32> to vector<64x128xbf16>
    %8 = math.tanh %7 : vector<64x128xbf16>
    %c0_5 = arith.constant 0 : index
    %c0_6 = arith.constant 0 : index
    %9 = vector.load %arg4[%c0_5, %c0_6] : memref<128x64xbf16, #tpu.memory_space<vmem>>, vector<128x64xbf16>
    %cst_7 = arith.constant dense<0.000000e+00> : vector<128x128xf32>
    %10 = tpu.matmul %9, %8, %cst_7 {dimension_numbers = #tpu.dot_dimension_numbers<[1], [0], [0], [1], [0, 0, 1, 1], [], []>} : vector<128x64xbf16>, vector<64x128xbf16>, vector<128x128xf32> -> vector<128x128xf32>
    %c0_8 = arith.constant 0 : index
    %c0_9 = arith.constant 0 : index
    %11 = vector.load %arg5[%c0_8, %c0_9] : memref<128x1xf32, #tpu.memory_space<vmem>>, vector<128x1xf32>
    %12 = vector.broadcast %11 : vector<128x1xf32> to vector<128x128xf32>
    %13 = arith.addf %10, %12 : vector<128x128xf32>
    %14 = arith.truncf %13 : vector<128x128xf32> to vector<128x128xbf16>
    %15 = math.tanh %14 : vector<128x128xbf16>
    %c0_10 = arith.constant 0 : index
    %c0_11 = arith.constant 0 : index
    %16 = vector.load %arg6[%c0_10, %c0_11] : memref<64x128xbf16, #tpu.memory_space<vmem>>, vector<64x128xbf16>
    %cst_12 = arith.constant dense<0.000000e+00> : vector<64x128xf32>
    %17 = tpu.matmul %16, %15, %cst_12 {dimension_numbers = #tpu.dot_dimension_numbers<[1], [0], [0], [1], [0, 0, 1, 1], [], []>} : vector<64x128xbf16>, vector<128x128xbf16>, vector<64x128xf32> -> vector<64x128xf32>
    %c0_13 = arith.constant 0 : index
    %c0_14 = arith.constant 0 : index
    %18 = vector.load %arg7[%c0_13, %c0_14] : memref<64x1xf32, #tpu.memory_space<vmem>>, vector<64x1xf32>
    %19 = vector.broadcast %18 : vector<64x1xf32> to vector<64x128xf32>
    %20 = arith.addf %17, %19 : vector<64x128xf32>
    %21 = arith.truncf %20 : vector<64x128xf32> to vector<64x128xbf16>
    %22 = math.tanh %21 : vector<64x128xbf16>
    %c0_15 = arith.constant 0 : index
    %c0_16 = arith.constant 0 : index
    %23 = vector.load %arg8[%c0_15, %c0_16] : memref<2x64xbf16, #tpu.memory_space<vmem>>, vector<2x64xbf16>
    %cst_17 = arith.constant dense<0.000000e+00> : vector<2x128xf32>
    %24 = tpu.matmul %23, %22, %cst_17 {dimension_numbers = #tpu.dot_dimension_numbers<[1], [0], [0], [1], [0, 0, 1, 1], [], []>} : vector<2x64xbf16>, vector<64x128xbf16>, vector<2x128xf32> -> vector<2x128xf32>
    %c0_18 = arith.constant 0 : index
    %c0_19 = arith.constant 0 : index
    %25 = vector.load %arg9[%c0_18, %c0_19] : memref<2x1xf32, #tpu.memory_space<vmem>>, vector<2x1xf32>
    %26 = vector.broadcast %25 : vector<2x1xf32> to vector<2x128xf32>
    %27 = arith.addf %24, %26 : vector<2x128xf32>
    %c0_20 = arith.constant 0 : index
    %c0_21 = arith.constant 0 : index
    %28 = vector.load %arg10[%c0_20, %c0_21] : memref<2x128xf32, #tpu.memory_space<vmem>>, vector<2x128xf32>
    tpu.vector_store %arg10[%c0_20, %c0_21], %27 {strides = array<i32>} : memref<2x128xf32, #tpu.memory_space<vmem>>, vector<2x128xf32>,
    return
  }
  func.func @transform_0(%arg0: i32) -> (i32, i32) {
    %c0_i32 = arith.constant 0 : i32
    %c0_i32_0 = arith.constant 0 : i32
    return %c0_i32, %arg0 : i32, i32
  }
  func.func @transform_1(%arg0: i32) -> (i32, i32) {
    %c0_i32 = arith.constant 0 : i32
    %c0_i32_0 = arith.constant 0 : i32
    %c0_i32_1 = arith.constant 0 : i32
    return %c0_i32, %c0_i32_0 : i32, i32
  }
  func.func @transform_2(%arg0: i32) -> (i32, i32) {
    %c0_i32 = arith.constant 0 : i32
    %c0_i32_0 = arith.constant 0 : i32
    %c0_i32_1 = arith.constant 0 : i32
    return %c0_i32, %c0_i32_0 : i32, i32
  }
  func.func @transform_3(%arg0: i32) -> (i32, i32) {
    %c0_i32 = arith.constant 0 : i32
    %c0_i32_0 = arith.constant 0 : i32
    %c0_i32_1 = arith.constant 0 : i32
    return %c0_i32, %c0_i32_0 : i32, i32
  }
  func.func @transform_4(%arg0: i32) -> (i32, i32) {
    %c0_i32 = arith.constant 0 : i32
    %c0_i32_0 = arith.constant 0 : i32
    %c0_i32_1 = arith.constant 0 : i32
    return %c0_i32, %c0_i32_0 : i32, i32
  }
  func.func @transform_5(%arg0: i32) -> (i32, i32) {
    %c0_i32 = arith.constant 0 : i32
    %c0_i32_0 = arith.constant 0 : i32
    %c0_i32_1 = arith.constant 0 : i32
    return %c0_i32, %c0_i32_0 : i32, i32
  }
  func.func @transform_6(%arg0: i32) -> (i32, i32) {
    %c0_i32 = arith.constant 0 : i32
    %c0_i32_0 = arith.constant 0 : i32
    %c0_i32_1 = arith.constant 0 : i32
    return %c0_i32, %c0_i32_0 : i32, i32
  }
  func.func @transform_7(%arg0: i32) -> (i32, i32) {
    %c0_i32 = arith.constant 0 : i32
    %c0_i32_0 = arith.constant 0 : i32
    %c0_i32_1 = arith.constant 0 : i32
    return %c0_i32, %c0_i32_0 : i32, i32
  }
  func.func @transform_8(%arg0: i32) -> (i32, i32) {
    %c0_i32 = arith.constant 0 : i32
    %c0_i32_0 = arith.constant 0 : i32
    %c0_i32_1 = arith.constant 0 : i32
    return %c0_i32, %c0_i32_0 : i32, i32
  }
  func.func @transform_9(%arg0: i32) -> (i32, i32) {
    %c0_i32 = arith.constant 0 : i32
    %c0_i32_0 = arith.constant 0 : i32
    return %c0_i32, %arg0 : i32, i32
  }
}

</mosaic_0001>

<bundles_post_ra>
// kernel: tpu_custom_call.1
= control target key start
LH: loop header
LB: loop body
LE: loop exit
PB: predicated region body
PF: predicated region fallthrough
CT: control target
= control target key end

     0   :  { %vm125_vm0 = vcmask 1040384   ;;  %v825_v3 = vmov 0   ;;  %vm126_vm1 = vcmask 1041408   ;;  %v826_v5 = vmov 65535   ;;  %s1060_s0 = inlined_call_operand.vmem [shape: f32[3,128], index: 0, kind: input, shape index: {}]   ;;  %s1061_s1 = inlined_call_operand.vmem [shape: bf16[64,3], index: 1, kind: input, shape index: {}]   ;;  %s1062_s2 = inlined_call_operand.vmem [shape: f32[64,1], index: 2, kind: input, shape index: {}]   ;;  %s1063_s3 = inlined_call_operand.vmem [shape: bf16[128,64], index: 3, kind: input, shape index: {}]   ;;  %s1064_s4 = inlined_call_operand.vmem [shape: f32[128,1], index: 4, kind: input, shape index: {}]   ;;  %s1065_s5 = inlined_call_operand.vmem [shape: bf16[64,128], index: 5, kind: input, shape index: {}]   ;;  %s1066_s6 = inlined_call_operand.vmem [shape: f32[64,1], index: 6, kind: input, shape index: {}]   ;;  %s1067_s7 = inlined_call_operand.vmem [shape: bf16[2,64], index: 7, kind: input, shape index: {}]   ;;  %s1068_s8 = inlined_call_operand.vmem [shape: f32[2,1], index: 8, kind: input, shape index: {}]   ;;  %s1069_s9 = inlined_call_operand.hbm [shape: f32[2,128], index: 9, kind: output, shape index: {}]  }
   0x1   :  { %v50_v0 = vld [vmem:[%s1062_s2 + $0x30] sm:$0xff]  ;;  %v48_v1 = vld [vmem:[%s1062_s2 + $0x20] sm:$0xff]  ;;  %733 = vset.pattern.permute.xlu1 %v825_v3  ;;  %732 = vset.pattern.permute.xlu0 %v825_v3  ;;  %v127_v6 = vsel %vm125_vm0, 4294967295, %v826_v5 }
   0x2   :  { %v34_v2 = vld [vmem:[%s1060_s0] sm:$0x7]  ;;  %84 = vperm.xlu0 %732, %v50_v0   ;;  %74 = vperm.xlu1 %733, %v48_v1   ;;  %v46_v7 = vld [vmem:[%s1062_s2 + $0x10] sm:$0xff]  ;;  %v128_v8 = vsel %vm126_vm1, %v127_v6, 0 }
   0x3   :  { %v35_v4 = vpack.c.bf16 %v34_v2, %v34_v2  ;;  %734 = vset.pattern.permute.xlu2 %v825_v3  ;;  %v709_v10 = vld [vmem:[%s1061_s1] sm:$0xff] }
   0x4   :  { %64 = vperm.xlu2 %734, %v46_v7  }
   0x5   :  { %v130_v9 = vand.u32 %v128_v8, %v35_v4 }
   0x6   :  { %14 = vsyncpa [#allocation3], 0  ;;  %vm112_vm2 = vcmask 23552   ;;  %v51_v11 = vld [vmem:[%s1062_s2 + $0x38] sm:$0xff]  ;;  %v49_v12 = vld [vmem:[%s1062_s2 + $0x28] sm:$0xff]  ;;  %vm337_vm3 = vcmask 523264  }
   0x7   :  { %139 = vmatpush.bf16.msra.mxu0 %v130_v9  ;;  %v47_v13 = vld [vmem:[%s1062_s2 + $0x18] sm:$0xff]  ;;  %v45_v14 = vld [vmem:[%s1062_s2 + $0x8] sm:$0xff]  ;;  %v44_v15 = vld [vmem:[%s1062_s2] sm:$0xff]  ;;  %s827_s12 = smov [#allocation2]  }
   0x8   :  { %v215_v16 = vld [vmem:[%s1064_s4 + $0x70] sm:$0xff]  ;;  %v710_v17 = vld [vmem:[%s1061_s1 + $0x8] sm:$0xff]  ;;  %v213_v18 = vld [vmem:[%s1064_s4 + $0x60] sm:$0xff]  ;;  %s621_s13 = sshll.u32 %s827_s12, 4  ;;  %s622_s13 = int_to_ptr.vmem [resolvable:$true] %s621_s13 }
   0x9   :  { %v216_v19 = vld [vmem:[%s1064_s4 + $0x78] sm:$0xff]  ;;  %v214_v20 = vld [vmem:[%s1064_s4 + $0x68] sm:$0xff]  ;;  %v211_v22 = vld [vmem:[%s1064_s4 + $0x50] sm:$0xff] }
   0xa   :  { %648 = vmatmul.msk.bf16.vlgmr.msra.gmra.mxu0 %vm112_vm2, %v709_v10  ;;  %89 = vperm.xlu0 %732, %v51_v11   ;;  %v212_v21 = vld [vmem:[%s1064_s4 + $0x58] sm:$0xff]  ;;  %v209_v23 = vld [vmem:[%s1064_s4 + $0x40] sm:$0xff]  ;;  %v711_v24 = vld [vmem:[%s1061_s1 + $0x10] sm:$0xff] }
   0xb   :  { %79 = vperm.xlu1 %733, %v49_v12   ;;  %v207_v25 = vld [vmem:[%s1064_s4 + $0x30] sm:$0xff]  ;;  %v210_v26 = vld [vmem:[%s1064_s4 + $0x48] sm:$0xff]  ;;  %v208_v27 = vld [vmem:[%s1064_s4 + $0x38] sm:$0xff] }
   0xc   :  { %69 = vperm.xlu2 %734, %v47_v13   ;;  %v206_v28 = vld [vmem:[%s1064_s4 + $0x28] sm:$0xff]  ;;  %v205_v29 = vld [vmem:[%s1064_s4 + $0x20] sm:$0xff]  ;;  %v203_v30 = vld [vmem:[%s1064_s4 + $0x10] sm:$0xff] }
   0xd   :  { %v712_v31 = vld [vmem:[%s1061_s1 + $0x18] sm:$0xff]  ;;  %v201_v32 = vld [vmem:[%s1064_s4] sm:$0xff]  ;;  %v202_v34 = vld [vmem:[%s1064_s4 + $0x8] sm:$0xff] }
   0xe   :  { %v204_v33 = vld [vmem:[%s1064_s4 + $0x18] sm:$0xff]  ;;  %v473_v36 = vld [vmem:[%s1066_s6 + $0x30] sm:$0xff]  ;;  %v471_v37 = vld [vmem:[%s1066_s6 + $0x20] sm:$0xff] }
   0xf   :  { %v474_v35 = vld [vmem:[%s1066_s6 + $0x38] sm:$0xff]  ;;  %v469_v38 = vld [vmem:[%s1066_s6 + $0x10] sm:$0xff]  ;;  %v472_v39 = vld [vmem:[%s1066_s6 + $0x28] sm:$0xff] }
  0x10   :  { %v470_v40 = vld [vmem:[%s1066_s6 + $0x18] sm:$0xff]  ;;  %v468_v41 = vld [vmem:[%s1066_s6 + $0x8] sm:$0xff]  ;;  %v467_v42 = vld [vmem:[%s1066_s6] sm:$0xff] }
  0x11   :  { %v593_v43 = vld [vmem:[%s1068_s8] sm:$0x3]  ;;  %s623_s8 = sshll.u32 %s1069_s9, 4  ;;  %s624_s8 = int_to_ptr.hbm [resolvable:$true] %s623_s8 }
  0x12   :  { %54 = vperm.xlu0 %732, %v44_v15  }
  0x13   :  { %59 = vperm.xlu1 %733, %v45_v14  }
  0x14   :  { %289 = vperm.xlu2 %734, %v215_v16  }
  0x1a   :  { %649 = vmatmul.msk.bf16.gmra.mxu0 %vm112_vm2, %v710_v17  ;;  %294 = vperm.xlu0 %732, %v216_v19  }
  0x1b   :  { %279 = vperm.xlu1 %733, %v213_v18  }
  0x1c   :  { %284 = vperm.xlu2 %734, %v214_v20  }
  0x22   :  { %269 = vperm.xlu0 %732, %v211_v22  }
  0x23   :  { %274 = vperm.xlu1 %733, %v212_v21  }
  0x24   :  { %259 = vperm.xlu2 %734, %v209_v23  }
  0x2a   :  { %650 = vmatmul.msk.bf16.gmra.mxu0 %vm112_vm2, %v711_v24  ;;  %264 = vperm.xlu0 %732, %v210_v26  }
  0x2b   :  { %249 = vperm.xlu1 %733, %v207_v25  }
  0x2c   :  { %254 = vperm.xlu2 %734, %v208_v27  }
  0x32   :  { %239 = vperm.xlu0 %732, %v205_v29   ;;  %v718_v29 = vld [vmem:[%s1063_s3 + $0x28] sm:$0xff] }
  0x33   :  { %244 = vperm.xlu1 %733, %v206_v28   ;;  %v713_v28 = vld [vmem:[%s1063_s3] sm:$0xff] }
  0x34   :  { %229 = vperm.xlu2 %734, %v203_v30   ;;  %v714_v30 = vld [vmem:[%s1063_s3 + $0x8] sm:$0xff] }
  0x3a   :  { %651 = vmatmul.msk.bf16.gmra.mxu0 %vm112_vm2, %v712_v31  ;;  %234 = vperm.xlu0 %732, %v204_v33   ;;  %v719_v31 = vld [vmem:[%s1063_s3 + $0x30] sm:$0xff]  ;;  %v720_v33 = vld [vmem:[%s1063_s3 + $0x38] sm:$0xff] }
  0x3b   :  { %219 = vperm.xlu1 %733, %v201_v32   ;;  %v715_v32 = vld [vmem:[%s1063_s3 + $0x10] sm:$0xff] }
  0x3c   :  { %224 = vperm.xlu2 %734, %v202_v34   ;;  %v716_v34 = vld [vmem:[%s1063_s3 + $0x18] sm:$0xff] }
  0x42   :  { %507 = vperm.xlu0 %732, %v473_v36  }
  0x43   :  { %512 = vperm.xlu1 %733, %v474_v35   ;;  %v717_v35 = vld [vmem:[%s1063_s3 + $0x20] sm:$0xff] }
  0x44   :  { %497 = vperm.xlu2 %734, %v471_v37  }
  0x4a   :  { %502 = vperm.xlu0 %732, %v472_v39  }
  0x4b   :  { %487 = vperm.xlu1 %733, %v469_v38  }
  0x4c   :  { %492 = vperm.xlu2 %734, %v470_v40  }
  0x52   :  { %477 = vperm.xlu0 %732, %v467_v42  }
  0x53   :  { %482 = vperm.xlu1 %733, %v468_v41  }
  0x54   :  { %596 = vperm.xlu2 %734, %v593_v43  }
  0x5e   :  { %v65_v52 = vpop.permute.xlu2 %64 }
  0x66   :  { %v70_v58 = vpop.permute.xlu2 %69 }
  0x6e   :  { %v290_v36 = vpop.permute.xlu2 %289 }
  0x74   :  { %v75_v49 = vpop.permute.xlu1 %74  ;;  %v85_v50 = vpop.permute.xlu0 %84 }
  0x76   :  { %v285_v37 = vpop.permute.xlu2 %284 }
  0x7c   :  { %v90_v55 = vpop.permute.xlu0 %89 }
  0x7d   :  { %v80_v54 = vpop.permute.xlu1 %79 }
  0x7e   :  { %v1028_v39 = vpop.permute.xlu2 %259 }
  0x84   :  { %v55_v3 = vpop.permute.xlu0 %54 }
  0x85   :  { %v60_v0 = vpop.permute.xlu1 %59 }
  0x86   :  { %v255_v41 = vpop.permute.xlu2 %254 }
  0x87   :  { %v141_v44 = vpop.f32.mrf.mxu0 }
  0x88   :  { %v142_v10 = vadd.f32 %v141_v44, %v55_v3 }
  0x8d   :  { %v280_v38 = vpop.permute.xlu1 %279 }
  0x8e   :  { %v1030_v43 = vpop.permute.xlu2 %229 }
  0x8f   :  { %v143_v45 = vpop.f32.mrf.mxu0 }
  0x90   :  { %v144_v4 = vadd.f32 %v143_v45, %v60_v0 }
  0x92   :  { %v161_v11 = vpack.c.bf16 %v144_v4, %v142_v10 }
  0x94   :  { %v165_v15 = vunpack.c.l.bf16 %v161_v11  ;;  %v166_v17 = vunpack.c.h.bf16 %v161_v11 }
  0x95   :  { %v275_v40 = vpop.permute.xlu1 %274 }
  0x97   :  { %v146_v46 = vpop.f32.mrf.mxu0 }
  0x98   :  { %v147_v1 = vadd.f32 %v146_v46, %v65_v52 }
  0x9d   :  { %v250_v42 = vpop.permute.xlu1 %249 }
  0x9f   :  { %v148_v47 = vpop.f32.mrf.mxu0 }
  0xa0   :  { %v149_v60 = vadd.f32 %v148_v47, %v70_v58  ;;  %v225_v47 = vpop.permute.xlu2 %224 }
  0xa2   :  { %v162_v5 = vpack.c.bf16 %v149_v60, %v147_v1 }
  0xa4   :  { %v167_v12 = vunpack.c.l.bf16 %v162_v5  ;;  %v168_v13 = vunpack.c.h.bf16 %v162_v5 }
  0xa5   :  { %v245_v44 = vpop.permute.xlu1 %244 }
  0xa7   :  { %v151_v48 = vpop.f32.mrf.mxu0 }
  0xa8   :  { %v152_v57 = vadd.f32 %v151_v48, %v75_v49 }
  0xad   :  { %v220_v48 = vpop.permute.xlu1 %219 }
  0xaf   :  { %v153_v51 = vpop.f32.mrf.mxu0 }
  0xb0   :  { %v154_v56 = vadd.f32 %v153_v51, %v80_v54 }
  0xb2   :  { %v163_v61 = vpack.c.bf16 %v154_v56, %v152_v57 }
  0xb4   :  { %v169_v6 = vunpack.c.l.bf16 %v163_v61  ;;  %v170_v9 = vunpack.c.h.bf16 %v163_v61 }
  0xb7   :  { %v156_v53 = vpop.f32.mrf.mxu0 }
  0xb8   :  { %v157_v62 = vadd.f32 %v156_v53, %v85_v50 }
  0xbf   :  { %v158_v59 = vpop.f32.mrf.mxu0 }
  0xc0   :  { %v159_v63 = vadd.f32 %v158_v59, %v90_v55  ;;  %v295_v59 = vpop.permute.xlu0 %294 }
  0xc2   :  { %v164_v2 = vpack.c.bf16 %v159_v63, %v157_v62 }
  0xc4   :  { %v171_v7 = vunpack.c.l.bf16 %v164_v2  ;;  %v172_v8 = vunpack.c.h.bf16 %v164_v2 }
  0xc6   :  { %735 = vtanh.f32 %v171_v7 }
  0xc7   :  { %737 = vtanh.f32 %v172_v8 }
  0xc8   :  { %739 = vtanh.f32 %v169_v6  ;;  %v270_v63 = vpop.permute.xlu0 %269 }
  0xc9   :  { %741 = vtanh.f32 %v170_v9 }
  0xca   :  { %743 = vtanh.f32 %v167_v12 }
  0xcb   :  { %745 = vtanh.f32 %v168_v13 }
  0xcc   :  { %v736_v14 = vpop.eup %735  ;;  %747 = vtanh.f32 %v165_v15 }
  0xcd   :  { %v738_v16 = vpop.eup %737  ;;  %749 = vtanh.f32 %v166_v17 }
  0xce   :  { %v740_v18 = vpop.eup %739  ;;  %v184_v19 = vpack.c.bf16 %v738_v16, %v736_v14 }
  0xcf   :  { %v742_v20 = vpop.eup %741 }
  0xd0   :  { %366 = vmatpush.bf16.msra.mxu1 %v184_v19  ;;  %725 = vmatpush.bf16.msra.mxu3 %v184_v19  ;;  %v744_v21 = vpop.eup %743  ;;  %v183_v22 = vpack.c.bf16 %v742_v20, %v740_v18  ;;  %v265_v14 = vpop.permute.xlu0 %264 }
  0xd1   :  { %v746_v23 = vpop.eup %745 }
  0xd2   :  { %v748_v24 = vpop.eup %747  ;;  %v182_v25 = vpack.c.bf16 %v746_v23, %v744_v21 }
  0xd3   :  { %v750_v26 = vpop.eup %749 }
  0xd4   :  { %367 = vmatpush.bf16.msra.mxu1 %v183_v22  ;;  %726 = vmatpush.bf16.msra.mxu3 %v183_v22  ;;  %v181_v27 = vpack.c.bf16 %v750_v26, %v748_v24 }
  0xd8   :  { %368 = vmatpush.bf16.msra.mxu1 %v182_v25  ;;  %727 = vmatpush.bf16.msra.mxu3 %v182_v25  ;;  %v240_v25 = vpop.permute.xlu0 %239 }
  0xdc   :  { %369 = vmatpush.bf16.msra.mxu1 %v181_v27  ;;  %728 = vmatpush.bf16.msra.mxu3 %v181_v27 }
  0xdf   :  { %684 = vmatmul.msk.bf16.vlgmr.msra.gmra.mxu1 %vm337_vm3, %v713_v28  ;;  %689 = vmatmul.msk.bf16.vlgmr.msra.gmra.mxu3 %vm337_vm3, %v718_v29 }
  0xef   :  { %685 = vmatmul.msk.bf16.gmra.mxu1 %vm337_vm3, %v714_v30  ;;  %690 = vmatmul.msk.bf16.gmra.mxu3 %vm337_vm3, %v719_v31 }
  0xff   :  { %686 = vmatmul.msk.bf16.gmra.mxu1 %vm337_vm3, %v715_v32  ;;  %691 = vmatmul.msk.bf16.gmra.mxu3 %vm337_vm3, %v720_v33 }
 0x10f   :  { %687 = vmatmul.msk.bf16.gmra.mxu1 %vm337_vm3, %v716_v34 }
 0x11f   :  { %688 = vmatmul.msk.bf16.gmra.mxu1 %vm337_vm3, %v717_v35 }
 0x15c   :  { %v371_v45 = vpop.f32.mrf.mxu1 }
 0x15d   :  { %v372_v50 = vadd.f32 %v371_v45, %v220_v48 }
 0x162   :  { %v396_v46 = vpop.f32.mrf.mxu3 }
 0x163   :  { %v397_v7 = vadd.f32 %v396_v46, %v270_v63 }
 0x164   :  { %v373_v49 = vpop.f32.mrf.mxu1 }
 0x165   :  { %v374_v51 = vadd.f32 %v373_v49, %v225_v47 }
 0x167   :  { %v1032_v52 = vpack.c.bf16 %v374_v51, %v372_v50 }
 0x16a   :  { %v398_v53 = vpop.f32.mrf.mxu3 }
 0x16b   :  { %v399_v2 = vadd.f32 %v398_v53, %v275_v40 }
 0x16c   :  { %v1034_v54 = vpop.f32.mrf.mxu1 }
 0x16d   :  { %v416_v9 = vpack.c.bf16 %v399_v2, %v397_v7  ;;  %v724_v7 = vld [vmem:[%s1065_s5 + $0x18] sm:$0xff] }
 0x16f   :  { %v429_v15 = vunpack.c.l.bf16 %v416_v9  ;;  %v430_v16 = vunpack.c.h.bf16 %v416_v9 }
 0x172   :  { %v401_v55 = vpop.f32.mrf.mxu3 }
 0x173   :  { %v402_v0 = vadd.f32 %v401_v55, %v280_v38 }
 0x174   :  { %v378_v56 = vpop.f32.mrf.mxu1 }
 0x17a   :  { %v403_v57 = vpop.f32.mrf.mxu3 }
 0x17b   :  { %v404_v62 = vadd.f32 %v403_v57, %v285_v37 }
 0x17c   :  { %v381_v58 = vpop.f32.mrf.mxu1 }
 0x17d   :  { %v417_v3 = vpack.c.bf16 %v404_v62, %v402_v0  ;;  %v382_v37 = vadd.f32 %v381_v58, %v240_v25 }
 0x17f   :  { %v431_v10 = vunpack.c.l.bf16 %v417_v3  ;;  %v432_v13 = vunpack.c.h.bf16 %v417_v3 }
 0x182   :  { %v406_v60 = vpop.f32.mrf.mxu3 }
 0x183   :  { %v407_v4 = vadd.f32 %v406_v60, %v290_v36  ;;  %v235_v36 = vpop.permute.xlu0 %234 }
 0x184   :  { %v383_v61 = vpop.f32.mrf.mxu1  ;;  %v379_v40 = vadd.f32 %v378_v56, %v235_v36 }
 0x185   :  { %v384_v32 = vadd.f32 %v383_v61, %v245_v44 }
 0x187   :  { %v413_v45 = vpack.c.bf16 %v384_v32, %v382_v37 }
 0x189   :  { %v423_v44 = vunpack.c.l.bf16 %v413_v45  ;;  %v424_v50 = vunpack.c.h.bf16 %v413_v45 }
 0x18a   :  { %v408_v1 = vpop.f32.mrf.mxu3 }
 0x18b   :  { %v409_v5 = vadd.f32 %v408_v1, %v295_v59  ;;  %v419_v59 = vunpack.c.l.bf16 %v1032_v52 }
 0x18c   :  { %v386_v6 = vpop.f32.mrf.mxu1 }
 0x18d   :  { %v418_v8 = vpack.c.bf16 %v409_v5, %v407_v4  ;;  %v387_v30 = vadd.f32 %v386_v6, %v250_v42  ;;  %v722_v5 = vld [vmem:[%s1065_s5 + $0x8] sm:$0xff]  ;;  %v723_v6 = vld [vmem:[%s1065_s5 + $0x10] sm:$0xff] }
 0x18f   :  { %v433_v11 = vunpack.c.l.bf16 %v418_v8  ;;  %v434_v12 = vunpack.c.h.bf16 %v418_v8 }
 0x191   :  { %751 = vtanh.f32 %v433_v11 }
 0x192   :  { %753 = vtanh.f32 %v434_v12 }
 0x193   :  { %755 = vtanh.f32 %v431_v10 }
 0x194   :  { %757 = vtanh.f32 %v432_v13  ;;  %v388_v17 = vpop.f32.mrf.mxu1  ;;  %v513_v13 = vpop.permute.xlu1 %512 }
 0x195   :  { %759 = vtanh.f32 %v429_v15  ;;  %v389_v28 = vadd.f32 %v388_v17, %v255_v41  ;;  %v377_v41 = vadd.f32 %v1034_v54, %v1030_v43  ;;  %v420_v43 = vunpack.c.h.bf16 %v1032_v52  ;;  %v721_v52 = vld [vmem:[%s1065_s5] sm:$0xff]  ;;  %v508_v15 = vpop.permute.xlu0 %507 }
 0x196   :  { %761 = vtanh.f32 %v430_v16  ;;  %v498_v16 = vpop.permute.xlu2 %497 }
 0x197   :  { %v752_v18 = vpop.eup %751  ;;  %v414_v33 = vpack.c.bf16 %v389_v28, %v387_v30  ;;  %v412_v42 = vpack.c.bf16 %v379_v40, %v377_v41 }
 0x198   :  { %v754_v19 = vpop.eup %753 }
 0x199   :  { %v756_v20 = vpop.eup %755  ;;  %v458_v21 = vpack.c.bf16 %v754_v19, %v752_v18  ;;  %v425_v46 = vunpack.c.l.bf16 %v414_v33  ;;  %v426_v49 = vunpack.c.h.bf16 %v414_v33  ;;  %v421_v51 = vunpack.c.l.bf16 %v412_v42 }
 0x19a   :  { %v758_v22 = vpop.eup %757  ;;  %v422_v55 = vunpack.c.h.bf16 %v412_v42 }
 0x19b   :  { %539 = vmatpush.bf16.msra.mxu2 %v458_v21  ;;  %v760_v24 = vpop.eup %759  ;;  %v457_v26 = vpack.c.bf16 %v758_v22, %v756_v20 }
 0x19c   :  { %v391_v23 = vpop.f32.mrf.mxu1  ;;  %v762_v27 = vpop.eup %761 }
 0x19d   :  { %v456_v29 = vpack.c.bf16 %v762_v27, %v760_v24  ;;  %v392_v34 = vadd.f32 %v391_v23, %v1028_v39  ;;  %v488_v18 = vpop.permute.xlu1 %487  ;;  %v503_v19 = vpop.permute.xlu0 %502 }
 0x19e   :  { %v493_v22 = vpop.permute.xlu2 %492 }
 0x19f   :  { %540 = vmatpush.bf16.msra.mxu2 %v457_v26 }
 0x1a3   :  { %541 = vmatpush.bf16.msra.mxu2 %v456_v29 }
 0x1a4   :  { %v393_v31 = vpop.f32.mrf.mxu1 }
 0x1a5   :  { %v394_v35 = vadd.f32 %v393_v31, %v265_v14  ;;  %v483_v28 = vpop.permute.xlu1 %482  ;;  %v478_v36 = vpop.permute.xlu0 %477 }
 0x1a7   :  { %v415_v38 = vpack.c.bf16 %v394_v35, %v392_v34 }
 0x1a9   :  { %v427_v47 = vunpack.c.l.bf16 %v415_v38  ;;  %v428_v48 = vunpack.c.h.bf16 %v415_v38 }
 0x1ab   :  { %763 = vtanh.f32 %v427_v47 }
 0x1ac   :  { %765 = vtanh.f32 %v428_v48 }
 0x1ad   :  { %767 = vtanh.f32 %v425_v46 }
 0x1ae   :  { %769 = vtanh.f32 %v426_v49 }
 0x1af   :  { %771 = vtanh.f32 %v423_v44 }
 0x1b0   :  { %773 = vtanh.f32 %v424_v50 }
 0x1b1   :  { %v764_v39 = vpop.eup %763  ;;  %775 = vtanh.f32 %v421_v51 }
 0x1b2   :  { %v766_v53 = vpop.eup %765  ;;  %777 = vtanh.f32 %v422_v55 }
 0x1b3   :  { %v768_v56 = vpop.eup %767  ;;  %v455_v57 = vpack.c.bf16 %v766_v53, %v764_v39  ;;  %779 = vtanh.f32 %v419_v59  ;;  %v592_v59 = vld [vmem:[%s1067_s7] sm:$0x1] }
 0x1b4   :  { %v770_v58 = vpop.eup %769  ;;  %781 = vtanh.f32 %v420_v43  ;;  %v597_v43 = vpop.permute.xlu2 %596 }
 0x1b5   :  { %542 = vmatpush.bf16.msra.mxu2 %v455_v57  ;;  %v772_v54 = vpop.eup %771  ;;  %v454_v60 = vpack.c.bf16 %v770_v58, %v768_v56 }
 0x1b6   :  { %v774_v61 = vpop.eup %773 }
 0x1b7   :  { %v776_v62 = vpop.eup %775  ;;  %v453_v63 = vpack.c.bf16 %v774_v61, %v772_v54 }
 0x1b8   :  { %v778_v0 = vpop.eup %777 }
 0x1b9   :  { %543 = vmatpush.bf16.msra.mxu2 %v454_v60  ;;  %v780_v1 = vpop.eup %779  ;;  %v452_v2 = vpack.c.bf16 %v778_v0, %v776_v62 }
 0x1ba   :  { %v782_v3 = vpop.eup %781 }
 0x1bb   :  { %v451_v4 = vpack.c.bf16 %v782_v3, %v780_v1 }
 0x1bd   :  { %544 = vmatpush.bf16.msra.mxu2 %v453_v63 }
 0x1c1   :  { %545 = vmatpush.bf16.msra.mxu2 %v452_v2 }
 0x1c5   :  { %546 = vmatpush.bf16.msra.mxu2 %v451_v4 }
 0x1c8   :  { %547 = vmatmul.bf16.vlgmr.msra.gmra.mxu2 %v721_v52 }
 0x1d8   :  { %552 = vmatmul.bf16.gmra.mxu2 %v722_v5 }
 0x1e8   :  { %557 = vmatmul.bf16.gmra.mxu2 %v723_v6 }
 0x1f8   :  { %562 = vmatmul.bf16.gmra.mxu2 %v724_v7 }
 0x24b   :  { %v548_v8 = vpop.f32.mrf.mxu2 }
 0x24c   :  { %v549_v38 = vadd.f32 %v548_v8, %v478_v36 }
 0x253   :  { %v550_v9 = vpop.f32.mrf.mxu2 }
 0x254   :  { %v551_v31 = vadd.f32 %v550_v9, %v483_v28 }
 0x256   :  { %v568_v40 = vpack.c.bf16 %v551_v31, %v549_v38 }
 0x258   :  { %v572_v48 = vunpack.c.l.bf16 %v568_v40  ;;  %v573_v41 = vunpack.c.h.bf16 %v568_v40 }
 0x25b   :  { %v553_v10 = vpop.f32.mrf.mxu2 }
 0x25c   :  { %v554_v29 = vadd.f32 %v553_v10, %v488_v18 }
 0x263   :  { %v555_v11 = vpop.f32.mrf.mxu2 }
 0x264   :  { %v556_v24 = vadd.f32 %v555_v11, %v493_v22 }
 0x266   :  { %v569_v32 = vpack.c.bf16 %v556_v24, %v554_v29 }
 0x268   :  { %v574_v45 = vunpack.c.l.bf16 %v569_v32  ;;  %v575_v46 = vunpack.c.h.bf16 %v569_v32 }
 0x26b   :  { %v558_v12 = vpop.f32.mrf.mxu2 }
 0x26c   :  { %v559_v21 = vadd.f32 %v558_v12, %v498_v16 }
 0x273   :  { %v560_v14 = vpop.f32.mrf.mxu2 }
 0x274   :  { %v561_v20 = vadd.f32 %v560_v14, %v503_v19 }
 0x276   :  { %v570_v25 = vpack.c.bf16 %v561_v20, %v559_v21 }
 0x278   :  { %v576_v33 = vunpack.c.l.bf16 %v570_v25  ;;  %v577_v37 = vunpack.c.h.bf16 %v570_v25 }
 0x27b   :  { %v563_v17 = vpop.f32.mrf.mxu2 }
 0x27c   :  { %v564_v26 = vadd.f32 %v563_v17, %v508_v15 }
 0x283   :  { %v565_v23 = vpop.f32.mrf.mxu2 }
 0x284   :  { %v566_v27 = vadd.f32 %v565_v23, %v513_v13 }
 0x286   :  { %v571_v30 = vpack.c.bf16 %v566_v27, %v564_v26 }
 0x288   :  { %v578_v34 = vunpack.c.l.bf16 %v571_v30  ;;  %v579_v35 = vunpack.c.h.bf16 %v571_v30 }
 0x28a   :  { %783 = vtanh.f32 %v578_v34 }
 0x28b   :  { %785 = vtanh.f32 %v579_v35 }
 0x28c   :  { %787 = vtanh.f32 %v576_v33 }
 0x28d   :  { %789 = vtanh.f32 %v577_v37 }
 0x28e   :  { %791 = vtanh.f32 %v574_v45 }
 0x28f   :  { %793 = vtanh.f32 %v575_v46 }
 0x290   :  { %v784_v47 = vpop.eup %783  ;;  %795 = vtanh.f32 %v572_v48 }
 0x291   :  { %v786_v49 = vpop.eup %785  ;;  %797 = vtanh.f32 %v573_v41 }
 0x292   :  { %v788_v42 = vpop.eup %787  ;;  %v591_v44 = vpack.c.bf16 %v786_v49, %v784_v47 }
 0x293   :  { %v790_v50 = vpop.eup %789 }
 0x294   :  { %606 = vmatpush.bf16.msrb.mxu3 %v591_v44  ;;  %v792_v39 = vpop.eup %791  ;;  %v590_v51 = vpack.c.bf16 %v790_v50, %v788_v42 }
 0x295   :  { %v794_v53 = vpop.eup %793 }
 0x296   :  { %v796_v55 = vpop.eup %795  ;;  %v589_v56 = vpack.c.bf16 %v794_v53, %v792_v39 }
 0x297   :  { %v798_v57 = vpop.eup %797 }
 0x298   :  { %607 = vmatpush.bf16.msrb.mxu3 %v590_v51  ;;  %v588_v58 = vpack.c.bf16 %v798_v57, %v796_v55 }
 0x29c   :  { %608 = vmatpush.bf16.msrb.mxu3 %v589_v56 }
 0x2a0   :  { %609 = vmatpush.bf16.msrb.mxu3 %v588_v58 }
 0x2a3   :  { %708 = vmatmul.msk.bf16.vlgmr.msrb.gmra.mxu3 %vm337_vm3, %v592_v59 }
 0x326   :  { %v611_v54 = vpop.f32.mrf.mxu3 }
 0x327   :  { %v612_v60 = vadd.f32 %v611_v54, %v597_v43 }
 0x329   :  { %615 = vst [vmem:[#allocation2] sm:$0x3] %v612_v60 }
 0x32a   :  { %626 = dma.vmem_to_hbm [thread:$0]  %s622_s13, 32, %s624_s8, [#allocation3]  }
 0x32e   :  { %v613_v61 = vpop.f32.mrf.mxu3 }
 0x32f   :  { %823 = dma.done.wait [#allocation3], 32  }
 0x330   :  { %824 = vsyncadd [#allocation3], 4294967264 }
 0x331   :  { %631 = vsyncpa [#allocation3], 1 }

</bundles_post_ra>
